<compile_context>
chip_gen: v6e
topology: v6e:2x2x1
jax: 0.10.0
libtpu: 0.0.40
codegen_flags: <defaults>
</compile_context>

<pallas_src>
import functools

import jax
import jax.numpy as jnp
from jax.experimental import pallas as pl
from jax.experimental.pallas import tpu as pltpu

_LANE = 128
_SUBLANE = 8
_VMEM_BUDGET = 24 * 1024 * 1024        # target working set per pallas_call
_VMEM_LIMIT = 48 * 1024 * 1024         # scoped VMEM limit (safe on v5e/v6e/v7x)


def _round_up(x, m):
    return ((x + m - 1) // m) * m


def _pick_tm(m, row_in_bytes, row_out_bytes, resident_bytes, cap=512):
    """Largest row tile (multiple of 8, <= cap) whose double-buffered working
    set stays under the VMEM budget."""
    tm = min(cap, _round_up(m, _SUBLANE))
    while tm > _SUBLANE and (2 * tm * (row_in_bytes + row_out_bytes)
                             + resident_bytes > _VMEM_BUDGET):
        tm = max(_SUBLANE, _round_up(tm // 2, _SUBLANE))
    return tm


# ----------------------------- Pallas kernels ------------------------------

def _mm_bias_act_kernel(x_ref, w_ref, b_ref, o_ref, *, act):
    """o = act(x @ w + b); bf16 operands, f32 MXU accumulation."""
    acc = jnp.dot(x_ref[...], w_ref[...], preferred_element_type=jnp.float32)
    acc = acc + b_ref[...]
    if act == "lrelu":                      # LeakyReLU(0.2)
        acc = jnp.where(acc > 0, acc, 0.2 * acc)
    o_ref[...] = acc.astype(o_ref.dtype)


def _cam_conv1x1_kernel(x_ref, gw_ref, mw_ref, w1_ref, w2_ref, b_ref,
                        y_ref, h_ref):
    """y = lrelu((x*gap_w) @ w1 + (x*gmp_w) @ w2 + b); h = sum_c y."""
    x = x_ref[...]
    xg = (x * gw_ref[...]).astype(jnp.bfloat16)
    xm = (x * mw_ref[...]).astype(jnp.bfloat16)
    acc = jnp.dot(xg, w1_ref[...], preferred_element_type=jnp.float32)
    acc = acc + jnp.dot(xm, w2_ref[...], preferred_element_type=jnp.float32)
    acc = acc + b_ref[...]
    y = jnp.where(acc > 0, acc, 0.2 * acc)
    y_ref[...] = y
    h_ref[...] = jnp.sum(y, axis=-1, keepdims=True)   # padded cols are zero


# ------------------------------- wrappers -----------------------------------

def fused_matmul(x, w, b=None, act="none"):
    """act(x @ w + b) tiled over rows; bf16 MXU, f32 accumulation, lane-dense out."""
    M, K = x.shape
    K2, N = w.shape
    assert K == K2
    n_pad = _round_up(N, _LANE)
    resident = 2 * K * n_pad * 2 + 2 * n_pad * 4           # weight + bias (x2 bufs)
    tm = _pick_tm(M, K * 2, n_pad * 4, resident)
    m_pad = _round_up(M, tm)

    xb = jnp.pad(x.astype(jnp.bfloat16), ((0, m_pad - M), (0, 0)))
    wb = jnp.pad(w.astype(jnp.bfloat16), ((0, 0), (0, n_pad - N)))
    bvec = b if b is not None else jnp.zeros((N,), jnp.float32)
    bb = jnp.pad(bvec.astype(jnp.float32), (0, n_pad - N)).reshape(1, n_pad)

    out = pl.pallas_call(
        functools.partial(_mm_bias_act_kernel, act=act),
        out_shape=jax.ShapeDtypeStruct((m_pad, n_pad), jnp.float32),
        grid=(m_pad // tm,),
        in_specs=[
            pl.BlockSpec((tm, K), lambda i: (i, 0)),
            pl.BlockSpec((K, n_pad), lambda i: (0, 0)),     # resident weight
            pl.BlockSpec((1, n_pad), lambda i: (0, 0)),     # resident bias
        ],
        out_specs=pl.BlockSpec((tm, n_pad), lambda i: (i, 0)),
        compiler_params=pltpu.CompilerParams(
            dimension_semantics=("parallel",),
            vmem_limit_bytes=_VMEM_LIMIT),
        cost_estimate=pl.CostEstimate(
            flops=2 * m_pad * K * n_pad,
            transcendentals=0,
            bytes_accessed=m_pad * K * 2 + K * n_pad * 2 + m_pad * n_pad * 4),
    )(xb, wb, bb)
    return out[:M, :N]


def cam_conv1x1(x, gap_w, gmp_w, w1, w2, b):
    """Fused CAM re-weighting + 1x1 conv + LeakyReLU + channel-sum heatmap."""
    M, C = x.shape
    Co = w1.shape[1]
    co_pad = _round_up(Co, _LANE)
    resident = 2 * (2 * C * co_pad * 2 + co_pad * 4 + 2 * C * 4)
    tm = _pick_tm(M, C * 4, co_pad * 4 + 4, resident)
    m_pad = _round_up(M, tm)

    xp = jnp.pad(x.astype(jnp.float32), ((0, m_pad - M), (0, 0)))
    gw = gap_w.reshape(1, C).astype(jnp.float32)
    mw = gmp_w.reshape(1, C).astype(jnp.float32)
    w1p = jnp.pad(w1.astype(jnp.bfloat16), ((0, 0), (0, co_pad - Co)))
    w2p = jnp.pad(w2.astype(jnp.bfloat16), ((0, 0), (0, co_pad - Co)))
    bp = jnp.pad(b.astype(jnp.float32), (0, co_pad - Co)).reshape(1, co_pad)

    y, h = pl.pallas_call(
        _cam_conv1x1_kernel,
        out_shape=(jax.ShapeDtypeStruct((m_pad, co_pad), jnp.float32),
                   jax.ShapeDtypeStruct((m_pad, 1), jnp.float32)),
        grid=(m_pad // tm,),
        in_specs=[
            pl.BlockSpec((tm, C), lambda i: (i, 0)),
            pl.BlockSpec((1, C), lambda i: (0, 0)),
            pl.BlockSpec((1, C), lambda i: (0, 0)),
            pl.BlockSpec((C, co_pad), lambda i: (0, 0)),
            pl.BlockSpec((C, co_pad), lambda i: (0, 0)),
            pl.BlockSpec((1, co_pad), lambda i: (0, 0)),
        ],
        out_specs=(pl.BlockSpec((tm, co_pad), lambda i: (i, 0)),
                   pl.BlockSpec((tm, 1), lambda i: (i, 0))),
        compiler_params=pltpu.CompilerParams(
            dimension_semantics=("parallel",),
            vmem_limit_bytes=_VMEM_LIMIT),
        cost_estimate=pl.CostEstimate(
            flops=4 * m_pad * C * co_pad,
            transcendentals=0,
            bytes_accessed=(m_pad * C * 4 + 2 * C * co_pad * 2
                            + m_pad * co_pad * 4 + m_pad * 4)),
    )(xp, gw, mw, w1p, w2p, bp)
    return y[:M, :Co], h[:M, :]


# -------------------------- conv glue (im2col) -------------------------------

def _reflect_pad1(x):
    return jnp.pad(x, ((0, 0), (1, 1), (1, 1), (0, 0)), mode="reflect")


def _im2col(x, k, stride):
    """NHWC -> (N*Ho*Wo, k*k*C) patches, tap-major / channel-minor."""
    N, H, W, C = x.shape
    Ho = (H - k) // stride + 1
    Wo = (W - k) // stride + 1
    taps = []
    for kh in range(k):
        for kw in range(k):
            taps.append(jax.lax.slice(
                x, (0, kh, kw, 0),
                (N, kh + stride * (Ho - 1) + 1, kw + stride * (Wo - 1) + 1, C),
                (1, stride, stride, 1)))
    patches = jnp.stack(taps, axis=3)              # (N, Ho, Wo, k*k, C)
    return patches.reshape(N * Ho * Wo, k * k * C), Ho, Wo


def conv4x4(x, w, b, stride, act):
    """ReflectionPad2d(1) + Conv2d(k=4, stride, pad=0) + activation.
    x: (N,H,W,Ci) channels-last; w: (Co,Ci,4,4) PyTorch layout."""
    xp = _reflect_pad1(x)
    N, Ci, Co = x.shape[0], x.shape[3], w.shape[0]
    patches, Ho, Wo = _im2col(xp, 4, stride)
    wm = jnp.transpose(w, (2, 3, 1, 0)).reshape(16 * Ci, Co)
    y = fused_matmul(patches, wm, b, act=act)
    return y.reshape(N, Ho, Wo, Co)


# --------------------------- params / forward -------------------------------

def _normal(key, shape, std=0.02):
    return std * jax.random.normal(key, shape, jnp.float32)


def _spectral_normalize(w, n_iter=30, eps=1e-12):
    """w / sigma_max(w.reshape(out, -1)) via power iteration (parameter prep)."""
    w2 = w.reshape(w.shape[0], -1).astype(jnp.float32)
    u = jnp.ones((w2.shape[0],), jnp.float32)
    u = u / jnp.linalg.norm(u)
    v = w2.T @ u
    for _ in range(n_iter):
        v = w2.T @ u
        v = v / (jnp.linalg.norm(v) + eps)
        u = w2 @ v
        u = u / (jnp.linalg.norm(u) + eps)
    sigma = u @ (w2 @ v)
    return w / sigma


def init_discriminator(key, input_nc, ndf=64, n_layers=5):
    specs = [(input_nc, ndf, 2)]
    for i in range(1, n_layers - 2):
        mult = 2 ** (i - 1)
        specs.append((ndf * mult, ndf * mult * 2, 2))
    mult = 2 ** (n_layers - 2 - 1)
    specs.append((ndf * mult, ndf * mult * 2, 1))
    C = ndf * 2 ** (n_layers - 2)

    keys = iter(jax.random.split(key, 2 * len(specs) + 8))
    model = []
    for (ci, co, s) in specs:
        w = _normal(next(keys), (co, ci, 4, 4))
        b = _normal(next(keys), (co,))
        model.append({"w": _spectral_normalize(w), "b": b, "stride": s})

    gap_w_orig = _normal(next(keys), (1, C))
    gmp_w_orig = _normal(next(keys), (1, C))
    return {
        "model": model,
        # NOTE: forward() uses parameters()[0] = weight_orig for the CAM multiply
        # but the spectrally-normalized weight inside the fc -> keep both.
        "gap_fc_w_orig": gap_w_orig,
        "gap_fc_w_sn": _spectral_normalize(gap_w_orig),
        "gmp_fc_w_orig": gmp_w_orig,
        "gmp_fc_w_sn": _spectral_normalize(gmp_w_orig),
        "conv1x1_w": _normal(next(keys), (C, 2 * C, 1, 1)),
        "conv1x1_b": _normal(next(keys), (C,)),
        "conv_w": _spectral_normalize(_normal(next(keys), (1, C, 4, 4))),
    }


def discriminator_forward(params, x_nchw):
    x = jnp.transpose(x_nchw, (0, 2, 3, 1)).astype(jnp.float32)   # NHWC internally

    # model: (n_layers-2) strided blocks + one stride-1 block, LeakyReLU fused
    for layer in params["model"]:
        x = conv4x4(x, layer["w"], layer["b"], layer["stride"], act="lrelu")

    N, H, W, C = x.shape
    x_flat = x.reshape(N * H * W, C)

    # TODO(synk): global avg/max pool + the two 1-wide FC logits are a tiny
    # (N, C) reduction/matvec, kept as plain-JAX glue.
    gap = jnp.mean(x, axis=(1, 2))                         # (N, C)
    gmp = jnp.max(x, axis=(1, 2))
    gap_logit = gap @ params["gap_fc_w_sn"].T              # (N, 1)
    gmp_logit = gmp @ params["gmp_fc_w_sn"].T
    cam_logit = jnp.concatenate([gap_logit, gmp_logit], axis=1)

    # CAM re-weighting + conv1x1 + LeakyReLU + heatmap, fused in one kernel.
    w1x1 = params["conv1x1_w"][:, :, 0, 0]                 # (C, 2C)
    w1 = w1x1[:, :C].T                                     # gap half  (C, C)
    w2 = w1x1[:, C:].T                                     # gmp half  (C, C)
    y_flat, hm_flat = cam_conv1x1(x_flat,
                                  params["gap_fc_w_orig"][0],
                                  params["gmp_fc_w_orig"][0],
                                  w1, w2, params["conv1x1_b"])
    y = y_flat.reshape(N, H, W, C)
    heatmap = jnp.transpose(hm_flat.reshape(N, H, W, 1), (0, 3, 1, 2))

    # final: ReflectionPad2d(1) + SN Conv2d(C, 1, k=4, s=1, bias=False)
    yp = _reflect_pad1(y)
    patches, Ho, Wo = _im2col(yp, 4, 1)
    wm = jnp.transpose(params["conv_w"], (2, 3, 1, 0)).reshape(16 * C, 1)
    out = fused_matmul(patches, wm, None, act="none")
    out = jnp.transpose(out.reshape(N, Ho, Wo, 1), (0, 3, 1, 2))
    return out, cam_logit, heatmap


# ---------------------------------- main ------------------------------------

if __name__ == "__main__":
    key = jax.random.PRNGKey(0)
    pkey, xkey = jax.random.split(key)

    input_nc, ndf, n_layers = 3, 8, 5
    params = init_discriminator(pkey, input_nc, ndf, n_layers)

    N, H, W = 2, 32, 32
    x = jax.random.normal(xkey, (N, input_nc, H, W), jnp.float32)

    out, cam_logit, heatmap = discriminator_forward(params, x)
    out, cam_logit, heatmap = jax.block_until_ready((out, cam_logit, heatmap))

    # spatial trace: 32 ->16 ->8 ->4 (stride-2) ->3 (stride-1) -> final conv -> 2
    assert out.shape == (N, 1, 2, 2), out.shape
    assert cam_logit.shape == (N, 2), cam_logit.shape
    assert heatmap.shape == (N, 1, 3, 3), heatmap.shape
    for t in (out, cam_logit, heatmap):
        assert bool(jnp.all(jnp.isfinite(t)))
    print("KERNEL_OK")
</pallas_src>

<mosaic_0001>
module attributes {stable_mosaic.version = 11 : i64} {
  func.func @_mm_bias_act_kernel(%arg0: i32, %arg1: memref<512x48xbf16, #tpu.memory_space<vmem>>, %arg2: memref<48x128xbf16, #tpu.memory_space<vmem>>, %arg3: memref<1x128xf32, #tpu.memory_space<vmem>>, %arg4: memref<512x128xf32, #tpu.memory_space<vmem>>) attributes {dimension_semantics = [#tpu.dimension_semantics<parallel>], iteration_bounds = array<i64: 1>, scalar_prefetch = 0 : i64, scratch_operands = 0 : i64, tpu.core_type = #tpu.core_type<tc>, window_params = [{transform_indices = @transform_0, window_bounds = array<i64: 512, 48>}, {pipeline_mode = #tpu.pipeline_mode<synchronous>, transform_indices = @transform_1, window_bounds = array<i64: 48, 128>}, {pipeline_mode = #tpu.pipeline_mode<synchronous>, transform_indices = @transform_2, window_bounds = array<i64: 1, 128>}, {transform_indices = @transform_3, window_bounds = array<i64: 512, 128>}]} {
    %c0 = arith.constant 0 : index
    %c0_0 = arith.constant 0 : index
    %0 = vector.load %arg1[%c0, %c0_0] : memref<512x48xbf16, #tpu.memory_space<vmem>>, vector<512x48xbf16>
    %c0_1 = arith.constant 0 : index
    %c0_2 = arith.constant 0 : index
    %1 = vector.load %arg2[%c0_1, %c0_2] : memref<48x128xbf16, #tpu.memory_space<vmem>>, vector<48x128xbf16>
    %cst = arith.constant dense<0.000000e+00> : vector<512x128xf32>
    %2 = tpu.matmul %0, %1, %cst {dimension_numbers = #tpu.dot_dimension_numbers<[1], [0], [0], [1], [0, 0, 1, 1], [], []>} : vector<512x48xbf16>, vector<48x128xbf16>, vector<512x128xf32> -> vector<512x128xf32>
    %c0_3 = arith.constant 0 : index
    %c0_4 = arith.constant 0 : index
    %3 = vector.load %arg3[%c0_3, %c0_4] : memref<1x128xf32, #tpu.memory_space<vmem>>, vector<1x128xf32>
    %4 = vector.broadcast %3 : vector<1x128xf32> to vector<512x128xf32>
    %5 = arith.addf %2, %4 : vector<512x128xf32>
    %cst_5 = arith.constant 0.000000e+00 : f32
    %6 = vector.broadcast %cst_5 : f32 to vector<512x128xf32>
    %7 = arith.cmpf ogt, %5, %6 : vector<512x128xf32>
    %cst_6 = arith.constant 2.000000e-01 : f32
    %8 = vector.broadcast %cst_6 : f32 to vector<512x128xf32>
    %9 = arith.mulf %8, %5 : vector<512x128xf32>
    %10 = arith.select %7, %5, %9 : vector<512x128xi1>, vector<512x128xf32>
    %c0_7 = arith.constant 0 : index
    %c0_8 = arith.constant 0 : index
    %11 = vector.load %arg4[%c0_7, %c0_8] : memref<512x128xf32, #tpu.memory_space<vmem>>, vector<512x128xf32>
    tpu.vector_store %arg4[%c0_7, %c0_8], %10 {strides = array<i32>} : memref<512x128xf32, #tpu.memory_space<vmem>>, vector<512x128xf32>,
    return
  }
  func.func @transform_0(%arg0: i32) -> (i32, i32) {
    %c0_i32 = arith.constant 0 : i32
    %c0_i32_0 = arith.constant 0 : i32
    return %arg0, %c0_i32 : i32, i32
  }
  func.func @transform_1(%arg0: i32) -> (i32, i32) {
    %c0_i32 = arith.constant 0 : i32
    %c0_i32_0 = arith.constant 0 : i32
    %c0_i32_1 = arith.constant 0 : i32
    return %c0_i32, %c0_i32_0 : i32, i32
  }
  func.func @transform_2(%arg0: i32) -> (i32, i32) {
    %c0_i32 = arith.constant 0 : i32
    %c0_i32_0 = arith.constant 0 : i32
    %c0_i32_1 = arith.constant 0 : i32
    return %c0_i32, %c0_i32_0 : i32, i32
  }
  func.func @transform_3(%arg0: i32) -> (i32, i32) {
    %c0_i32 = arith.constant 0 : i32
    %c0_i32_0 = arith.constant 0 : i32
    return %arg0, %c0_i32 : i32, i32
  }
}

</mosaic_0001>

<bundles_post_ra>
// kernel: tpu_custom_call.1
= control target key start
LH: loop header
LB: loop body
LE: loop exit
PB: predicated region body
PF: predicated region fallthrough
CT: control target
= control target key end

     0   :  { %vm271_vm0 = vcmask 392192   ;;  %s1400_s0 = inlined_call_operand.vmem [shape: bf16[512,48], index: 0, kind: input, shape index: {}]   ;;  %s1401_s1 = inlined_call_operand.vmem [shape: bf16[48,128], index: 1, kind: input, shape index: {}]   ;;  %s1402_s2 = inlined_call_operand.vmem [shape: f32[1,128], index: 2, kind: input, shape index: {}]   ;;  %s1403_s3 = inlined_call_operand.hbm [shape: f32[512,128], index: 3, kind: output, shape index: {}]  }
   0x1   :  { %v1111_v0 = vld [vmem:[%s1401_s1 + $0x10] sm:$0xff]   ;;  %v1112_v1 = vld [vmem:[%s1401_s1 + $0x8] sm:$0xff]   ;;  %v1113_v2 = vld [vmem:[%s1401_s1] sm:$0xff]  }
   0x2   :  { %1032 = vmatprep.subr.bf16.mxu0 %v1111_v0  ;;  %1102 = vmatprep.subr.bf16.mxu1 %v1111_v0  ;;  %v1114_v3 = vld [vmem:[%s1400_s0] sm:$0xff]   ;;  %v1116_v5 = vld [vmem:[%s1400_s0 + $0x8] sm:$0xff]   ;;  %v1118_v7 = vld [vmem:[%s1400_s0 + $0x10] sm:$0xff]  }
   0x3   :  { %1033 = vmatpush3.bf16.msra.mxu0 %v1111_v0  ;;  %1105 = vmatpush3.bf16.msra.mxu1 %v1111_v0  ;;  %v1115_v4 = vld [vmem:[%s1400_s0 + $0x80] sm:$0xff]   ;;  %v1117_v6 = vld [vmem:[%s1400_s0 + $0x88] sm:$0xff]   ;;  %v1119_v8 = vld [vmem:[%s1400_s0 + $0x90] sm:$0xff]  }
   0x4   :  { %1034 = vmatprep.subr.bf16.mxu0 %v1112_v1  ;;  %1103 = vmatprep.subr.bf16.mxu1 %v1112_v1  ;;  %v1120_v9 = vld [vmem:[%s1400_s0 + $0x18] sm:$0xff]   ;;  %v1122_v11 = vld [vmem:[%s1400_s0 + $0x20] sm:$0xff]   ;;  %v1124_v13 = vld [vmem:[%s1400_s0 + $0x28] sm:$0xff]  }
   0x5   :  { %1038 = vmatprep.mubr.msk.bf16.mxu0 %vm271_vm0, %v1114_v3  ;;  %1070 = vmatprep.mubr.msk.bf16.mxu1 %vm271_vm0, %v1115_v4  ;;  %v1121_v10 = vld [vmem:[%s1400_s0 + $0x98] sm:$0xff]   ;;  %v1123_v12 = vld [vmem:[%s1400_s0 + $0xa0] sm:$0xff]   ;;  %v1125_v14 = vld [vmem:[%s1400_s0 + $0xa8] sm:$0xff]  }
   0x6   :  { %v1126_v15 = vld [vmem:[%s1400_s0 + $0x30] sm:$0xff]   ;;  %v1128_v17 = vld [vmem:[%s1400_s0 + $0x38] sm:$0xff]   ;;  %v1130_v19 = vld [vmem:[%s1400_s0 + $0x40] sm:$0xff]  }
   0x7   :  { %1035 = vmatpush3.bf16.msra.mxu0 %v1112_v1  ;;  %1106 = vmatpush3.bf16.msra.mxu1 %v1112_v1  ;;  %v1127_v16 = vld [vmem:[%s1400_s0 + $0xb0] sm:$0xff]   ;;  %v1129_v18 = vld [vmem:[%s1400_s0 + $0xb8] sm:$0xff]   ;;  %v1131_v20 = vld [vmem:[%s1400_s0 + $0xc0] sm:$0xff]  }
   0x8   :  { %1036 = vmatprep.subr.bf16.mxu0 %v1113_v2  ;;  %1104 = vmatprep.subr.bf16.mxu1 %v1113_v2 }
   0xb   :  { %1037 = vmatpush3.bf16.msra.mxu0 %v1113_v2  ;;  %1107 = vmatpush3.bf16.msra.mxu1 %v1113_v2 }
   0xe   :  { %1039 = vmatmul.mubr.msk.bf16.vlgmr.msra.gmra.mxu0 %vm271_vm0, %v1116_v5  ;;  %1071 = vmatmul.mubr.msk.bf16.vlgmr.msra.gmra.mxu1 %vm271_vm0, %v1117_v6 }
   0xf   :  { %1042 = vmatprep.mubr.msk.bf16.mxu0 %vm271_vm0, %v1118_v7  ;;  %1074 = vmatprep.mubr.msk.bf16.mxu1 %vm271_vm0, %v1119_v8 }
  0x16   :  { %1043 = vmatmul.mubr.msk.bf16.gmra.mxu0 %vm271_vm0, %v1120_v9  ;;  %1075 = vmatmul.mubr.msk.bf16.gmra.mxu1 %vm271_vm0, %v1121_v10 }
  0x17   :  { %1046 = vmatprep.mubr.msk.bf16.mxu0 %vm271_vm0, %v1122_v11  ;;  %1078 = vmatprep.mubr.msk.bf16.mxu1 %vm271_vm0, %v1123_v12 }
  0x1e   :  { %1047 = vmatmul.mubr.msk.bf16.gmra.mxu0 %vm271_vm0, %v1124_v13  ;;  %1079 = vmatmul.mubr.msk.bf16.gmra.mxu1 %vm271_vm0, %v1125_v14 }
  0x1f   :  { %1050 = vmatprep.mubr.msk.bf16.mxu0 %vm271_vm0, %v1126_v15  ;;  %1082 = vmatprep.mubr.msk.bf16.mxu1 %vm271_vm0, %v1127_v16 }
  0x20   :  { %8 = vsyncpa [#allocation3], 0  ;;  %v1132_v21 = vld [vmem:[%s1400_s0 + $0x48] sm:$0xff]   ;;  %v1134_v23 = vld [vmem:[%s1400_s0 + $0x50] sm:$0xff]  }
  0x21   :  { %v1133_v22 = vld [vmem:[%s1400_s0 + $0xc8] sm:$0xff]   ;;  %v1135_v24 = vld [vmem:[%s1400_s0 + $0xd0] sm:$0xff]   ;;  %v1136_v25 = vld [vmem:[%s1400_s0 + $0x58] sm:$0xff]  }
  0x22   :  { %v1137_v26 = vld [vmem:[%s1400_s0 + $0xd8] sm:$0xff]   ;;  %v1138_v27 = vld [vmem:[%s1400_s0 + $0x60] sm:$0xff]   ;;  %v1140_v29 = vld [vmem:[%s1400_s0 + $0x68] sm:$0xff]  }
  0x23   :  { %v1139_v28 = vld [vmem:[%s1400_s0 + $0xe0] sm:$0xff]   ;;  %v1141_v30 = vld [vmem:[%s1400_s0 + $0xe8] sm:$0xff]   ;;  %v1142_v31 = vld [vmem:[%s1400_s0 + $0x70] sm:$0xff]  }
  0x24   :  { %v1143_v32 = vld [vmem:[%s1400_s0 + $0xf0] sm:$0xff]   ;;  %v1144_v33 = vld [vmem:[%s1400_s0 + $0x78] sm:$0xff]   ;;  %v1331_v35 = vld [vmem:[%s1402_s2] ss:$0 sm:$0xff] }
  0x25   :  { %v1145_v34 = vld [vmem:[%s1400_s0 + $0xf8] sm:$0xff]   ;;  %s1168_s0 = smov [#allocation2]  }
  0x26   :  { %1051 = vmatmul.mubr.msk.bf16.gmra.mxu0 %vm271_vm0, %v1128_v17  ;;  %1083 = vmatmul.mubr.msk.bf16.gmra.mxu1 %vm271_vm0, %v1129_v18  ;;  %s918_s2 = sshll.u32 %s1168_s0, 4  ;;  %s919_s2 = int_to_ptr.vmem [resolvable:$true] %s918_s2 }
  0x27   :  { %1054 = vmatprep.mubr.msk.bf16.mxu0 %vm271_vm0, %v1130_v19  ;;  %1086 = vmatprep.mubr.msk.bf16.mxu1 %vm271_vm0, %v1131_v20  ;;  %s1146_s27 = scalar_lea.vmem %s919_s2, 8192  ;;  %p1151_p1 = scmp.lt.s32.totalorder %s919_s2, %s919_s2 }
  0x28   :  { %p1147_p0 = scmp.ne.s32.totalorder %s919_s2, %s1146_s27  ;;  %p1152_p2 = scmp.lt.s32.totalorder %s1146_s27, %s1146_s27 }
  0x2a   :  { %p1153_p3 = por %p1152_p2, %p1151_p1 }
  0x2c   :  { %p1154_p4 = pnand %p1153_p3, %p1147_p0 }
  0x2e   :  { %1055 = vmatmul.mubr.msk.bf16.gmra.mxu0 %vm271_vm0, %v1132_v21  ;;  %1087 = vmatmul.mubr.msk.bf16.gmra.mxu1 %vm271_vm0, %v1133_v22 }
  0x2f   :  { %1058 = vmatprep.mubr.msk.bf16.mxu0 %vm271_vm0, %v1134_v23  ;;  %1090 = vmatprep.mubr.msk.bf16.mxu1 %vm271_vm0, %v1135_v24 }
  0x36   :  { %1059 = vmatmul.mubr.msk.bf16.gmra.mxu0 %vm271_vm0, %v1136_v25  ;;  %1091 = vmatmul.mubr.msk.bf16.gmra.mxu1 %vm271_vm0, %v1137_v26 }
  0x37   :  { %1062 = vmatprep.mubr.msk.bf16.mxu0 %vm271_vm0, %v1138_v27  ;;  %1094 = vmatprep.mubr.msk.bf16.mxu1 %vm271_vm0, %v1139_v28 }
  0x3e   :  { %1063 = vmatmul.mubr.msk.bf16.gmra.mxu0 %vm271_vm0, %v1140_v29  ;;  %1095 = vmatmul.mubr.msk.bf16.gmra.mxu1 %vm271_vm0, %v1141_v30 }
  0x3f   :  { %1066 = vmatprep.mubr.msk.bf16.mxu0 %vm271_vm0, %v1142_v31  ;;  %1098 = vmatprep.mubr.msk.bf16.mxu1 %vm271_vm0, %v1143_v32 }
  0x46   :  { %1067 = vmatmul.mubr.msk.bf16.gmra.mxu0 %vm271_vm0, %v1144_v33  ;;  %1099 = vmatmul.mubr.msk.bf16.gmra.mxu1 %vm271_vm0, %v1145_v34 }
  0xce   :  { %v1040_v36 = vpop.f32.mrf.mxu0  ;;  %v1072_v37 = vpop.f32.mrf.mxu1 }
  0xcf   :  { %v411_v38 = vadd.f32 %v1040_v36, %v1331_v35  ;;  %v539_v39 = vadd.f32 %v1072_v37, %v1331_v35 }
  0xd0   :  { %v402_v40 = vpop.f32.mrf.mxu0  ;;  %v530_v41 = vpop.f32.mrf.mxu1 }
  0xd1   :  { %vm659_vm1 = vcmp.gt.f32.partialorder %v411_v38, 0.0  ;;  %v723_v42 = vmul.f32 0.2, %v411_v38  ;;  %vm691_vm2 = vcmp.gt.f32.partialorder %v539_v39, 0.0  ;;  %v755_v43 = vmul.f32 0.2, %v539_v39 }
  0xd2   :  { %v403_v44 = vadd.f32 %v1331_v35, %v402_v40  ;;  %v531_v45 = vadd.f32 %v1331_v35, %v530_v41  ;;  %v1041_v46 = vpop.f32.mrf.mxu0  ;;  %v1073_v47 = vpop.f32.mrf.mxu1 }
  0xd3   :  { %v787_v48 = vsel %vm659_vm1, %v411_v38, %v723_v42  ;;  %v819_v49 = vsel %vm691_vm2, %v539_v39, %v755_v43  ;;  %v414_v50 = vadd.f32 %v1041_v46, %v1331_v35  ;;  %v542_v51 = vadd.f32 %v1073_v47, %v1331_v35 }
  0xd4   :  { %851 = vst [vmem:[#allocation2 + $0x10] sm:$0xff] %v787_v48  ;;  %883 = vst [vmem:[#allocation2 + $0x110] sm:$0xff] %v819_v49  ;;  %vm657_vm3 = vcmp.gt.f32.partialorder %v403_v44, 0.0  ;;  %v721_v52 = vmul.f32 0.2, %v403_v44  ;;  %vm689_vm4 = vcmp.gt.f32.partialorder %v531_v45, 0.0  ;;  %v405_v54 = vpop.f32.mrf.mxu0  ;;  %v533_v55 = vpop.f32.mrf.mxu1 }
  0xd5   :  { %v753_v53 = vmul.f32 0.2, %v531_v45  ;;  %vm660_vm5 = vcmp.gt.f32.partialorder %v414_v50, 0.0  ;;  %v724_v56 = vmul.f32 0.2, %v414_v50  ;;  %vm692_vm6 = vcmp.gt.f32.partialorder %v542_v51, 0.0 }
  0xd6   :  { %v756_v57 = vmul.f32 0.2, %v542_v51  ;;  %v785_v58 = vsel %vm657_vm3, %v403_v44, %v721_v52  ;;  %v406_v60 = vadd.f32 %v1331_v35, %v405_v54  ;;  %v534_v61 = vadd.f32 %v1331_v35, %v533_v55  ;;  %v1044_v62 = vpop.f32.mrf.mxu0  ;;  %v1076_v63 = vpop.f32.mrf.mxu1 }
  0xd7   :  { %v817_v59 = vsel %vm689_vm4, %v531_v45, %v753_v53  ;;  %849 = vst [vmem:[#allocation2] sm:$0xff] %v785_v58  ;;  %v788_v0 = vsel %vm660_vm5, %v414_v50, %v724_v56  ;;  %v427_v2 = vadd.f32 %v1044_v62, %v1331_v35  ;;  %v555_v3 = vadd.f32 %v1076_v63, %v1331_v35 }
  0xd8   :  { %881 = vst [vmem:[#allocation2 + $0x100] sm:$0xff] %v817_v59  ;;  %v820_v1 = vsel %vm692_vm6, %v542_v51, %v756_v57  ;;  %852 = vst [vmem:[#allocation2 + $0x18] sm:$0xff] %v788_v0  ;;  %vm658_vm7 = vcmp.gt.f32.partialorder %v406_v60, 0.0  ;;  %v722_v4 = vmul.f32 0.2, %v406_v60  ;;  %vm690_vm8 = vcmp.gt.f32.partialorder %v534_v61, 0.0  ;;  %v418_v6 = vpop.f32.mrf.mxu0  ;;  %v546_v7 = vpop.f32.mrf.mxu1 }
  0xd9   :  { %884 = vst [vmem:[#allocation2 + $0x118] sm:$0xff] %v820_v1  ;;  %v754_v5 = vmul.f32 0.2, %v534_v61  ;;  %vm663_vm9 = vcmp.gt.f32.partialorder %v427_v2, 0.0  ;;  %v727_v8 = vmul.f32 0.2, %v427_v2  ;;  %v419_v12 = vadd.f32 %v1331_v35, %v418_v6 }
  0xda   :  { %vm695_vm10 = vcmp.gt.f32.partialorder %v555_v3, 0.0  ;;  %v759_v9 = vmul.f32 0.2, %v555_v3  ;;  %v786_v10 = vsel %vm658_vm7, %v406_v60, %v722_v4  ;;  %v547_v13 = vadd.f32 %v1331_v35, %v546_v7  ;;  %v1045_v14 = vpop.f32.mrf.mxu0  ;;  %v1077_v15 = vpop.f32.mrf.mxu1 }
  0xdb   :  { %v818_v11 = vsel %vm690_vm8, %v534_v61, %v754_v5  ;;  %850 = vst [vmem:[#allocation2 + $0x8] sm:$0xff] %v786_v10  ;;  %v791_v16 = vsel %vm663_vm9, %v427_v2, %v727_v8  ;;  %v430_v18 = vadd.f32 %v1045_v14, %v1331_v35  ;;  %v558_v19 = vadd.f32 %v1077_v15, %v1331_v35 }
  0xdc   :  { %882 = vst [vmem:[#allocation2 + $0x108] sm:$0xff] %v818_v11  ;;  %v823_v17 = vsel %vm695_vm10, %v555_v3, %v759_v9  ;;  %855 = vst [vmem:[#allocation2 + $0x30] sm:$0xff] %v791_v16  ;;  %vm661_vm11 = vcmp.gt.f32.partialorder %v419_v12, 0.0  ;;  %v725_v20 = vmul.f32 0.2, %v419_v12  ;;  %vm693_vm12 = vcmp.gt.f32.partialorder %v547_v13, 0.0  ;;  %v421_v22 = vpop.f32.mrf.mxu0  ;;  %v549_v23 = vpop.f32.mrf.mxu1 }
  0xdd   :  { %887 = vst [vmem:[#allocation2 + $0x130] sm:$0xff] %v823_v17  ;;  %v757_v21 = vmul.f32 0.2, %v547_v13  ;;  %vm664_vm13 = vcmp.gt.f32.partialorder %v430_v18, 0.0  ;;  %v728_v24 = vmul.f32 0.2, %v430_v18  ;;  %v422_v28 = vadd.f32 %v1331_v35, %v421_v22 }
  0xde   :  { %vm696_vm14 = vcmp.gt.f32.partialorder %v558_v19, 0.0  ;;  %v760_v25 = vmul.f32 0.2, %v558_v19  ;;  %v789_v26 = vsel %vm661_vm11, %v419_v12, %v725_v20  ;;  %v550_v29 = vadd.f32 %v1331_v35, %v549_v23  ;;  %v1048_v30 = vpop.f32.mrf.mxu0  ;;  %v1080_v31 = vpop.f32.mrf.mxu1 }
  0xdf   :  { %v821_v27 = vsel %vm693_vm12, %v547_v13, %v757_v21  ;;  %853 = vst [vmem:[#allocation2 + $0x20] sm:$0xff] %v789_v26  ;;  %v792_v32 = vsel %vm664_vm13, %v430_v18, %v728_v24  ;;  %v443_v34 = vadd.f32 %v1048_v30, %v1331_v35  ;;  %v571_v36 = vadd.f32 %v1080_v31, %v1331_v35 }
  0xe0   :  { %885 = vst [vmem:[#allocation2 + $0x120] sm:$0xff] %v821_v27  ;;  %v824_v33 = vsel %vm696_vm14, %v558_v19, %v760_v25  ;;  %856 = vst [vmem:[#allocation2 + $0x38] sm:$0xff] %v792_v32  ;;  %vm662_vm15 = vcmp.gt.f32.partialorder %v422_v28, 0.0  ;;  %v726_v37 = vmul.f32 0.2, %v422_v28  ;;  %vm694_vm0 = vcmp.gt.f32.partialorder %v550_v29, 0.0  ;;  %v434_v39 = vpop.f32.mrf.mxu0  ;;  %v562_v40 = vpop.f32.mrf.mxu1 }
  0xe1   :  { %888 = vst [vmem:[#allocation2 + $0x138] sm:$0xff] %v824_v33  ;;  %v758_v38 = vmul.f32 0.2, %v550_v29  ;;  %vm667_vm1 = vcmp.gt.f32.partialorder %v443_v34, 0.0  ;;  %v731_v41 = vmul.f32 0.2, %v443_v34  ;;  %v435_v45 = vadd.f32 %v1331_v35, %v434_v39 }
  0xe2   :  { %vm699_vm2 = vcmp.gt.f32.partialorder %v571_v36, 0.0  ;;  %v763_v42 = vmul.f32 0.2, %v571_v36  ;;  %v790_v43 = vsel %vm662_vm15, %v422_v28, %v726_v37  ;;  %v563_v46 = vadd.f32 %v1331_v35, %v562_v40  ;;  %v1049_v47 = vpop.f32.mrf.mxu0  ;;  %v1081_v48 = vpop.f32.mrf.mxu1 }
  0xe3   :  { %v822_v44 = vsel %vm694_vm0, %v550_v29, %v758_v38  ;;  %854 = vst [vmem:[#allocation2 + $0x28] sm:$0xff] %v790_v43  ;;  %v795_v49 = vsel %vm667_vm1, %v443_v34, %v731_v41  ;;  %v446_v51 = vadd.f32 %v1049_v47, %v1331_v35  ;;  %v574_v52 = vadd.f32 %v1081_v48, %v1331_v35 }
  0xe4   :  { %886 = vst [vmem:[#allocation2 + $0x128] sm:$0xff] %v822_v44  ;;  %v827_v50 = vsel %vm699_vm2, %v571_v36, %v763_v42  ;;  %859 = vst [vmem:[#allocation2 + $0x50] sm:$0xff] %v795_v49  ;;  %vm665_vm3 = vcmp.gt.f32.partialorder %v435_v45, 0.0  ;;  %v729_v53 = vmul.f32 0.2, %v435_v45  ;;  %vm697_vm4 = vcmp.gt.f32.partialorder %v563_v46, 0.0  ;;  %v437_v55 = vpop.f32.mrf.mxu0  ;;  %v565_v56 = vpop.f32.mrf.mxu1 }
  0xe5   :  { %891 = vst [vmem:[#allocation2 + $0x150] sm:$0xff] %v827_v50  ;;  %v761_v54 = vmul.f32 0.2, %v563_v46  ;;  %vm668_vm5 = vcmp.gt.f32.partialorder %v446_v51, 0.0  ;;  %v732_v57 = vmul.f32 0.2, %v446_v51  ;;  %v438_v61 = vadd.f32 %v1331_v35, %v437_v55 }
  0xe6   :  { %vm700_vm6 = vcmp.gt.f32.partialorder %v574_v52, 0.0  ;;  %v764_v58 = vmul.f32 0.2, %v574_v52  ;;  %v793_v59 = vsel %vm665_vm3, %v435_v45, %v729_v53  ;;  %v566_v62 = vadd.f32 %v1331_v35, %v565_v56  ;;  %v1052_v63 = vpop.f32.mrf.mxu0  ;;  %v1084_v0 = vpop.f32.mrf.mxu1 }
  0xe7   :  { %v825_v60 = vsel %vm697_vm4, %v563_v46, %v761_v54  ;;  %857 = vst [vmem:[#allocation2 + $0x40] sm:$0xff] %v793_v59  ;;  %v796_v1 = vsel %vm668_vm5, %v446_v51, %v732_v57  ;;  %v459_v3 = vadd.f32 %v1052_v63, %v1331_v35  ;;  %v587_v4 = vadd.f32 %v1084_v0, %v1331_v35 }
  0xe8   :  { %889 = vst [vmem:[#allocation2 + $0x140] sm:$0xff] %v825_v60  ;;  %v828_v2 = vsel %vm700_vm6, %v574_v52, %v764_v58  ;;  %860 = vst [vmem:[#allocation2 + $0x58] sm:$0xff] %v796_v1  ;;  %vm666_vm7 = vcmp.gt.f32.partialorder %v438_v61, 0.0  ;;  %v730_v5 = vmul.f32 0.2, %v438_v61  ;;  %vm698_vm8 = vcmp.gt.f32.partialorder %v566_v62, 0.0  ;;  %v450_v7 = vpop.f32.mrf.mxu0  ;;  %v578_v8 = vpop.f32.mrf.mxu1 }
  0xe9   :  { %892 = vst [vmem:[#allocation2 + $0x158] sm:$0xff] %v828_v2  ;;  %v762_v6 = vmul.f32 0.2, %v566_v62  ;;  %vm671_vm9 = vcmp.gt.f32.partialorder %v459_v3, 0.0  ;;  %v735_v9 = vmul.f32 0.2, %v459_v3  ;;  %v451_v13 = vadd.f32 %v1331_v35, %v450_v7 }
  0xea   :  { %vm703_vm10 = vcmp.gt.f32.partialorder %v587_v4, 0.0  ;;  %v767_v10 = vmul.f32 0.2, %v587_v4  ;;  %v794_v11 = vsel %vm666_vm7, %v438_v61, %v730_v5  ;;  %v579_v14 = vadd.f32 %v1331_v35, %v578_v8  ;;  %v1053_v15 = vpop.f32.mrf.mxu0  ;;  %v1085_v16 = vpop.f32.mrf.mxu1 }
  0xeb   :  { %v826_v12 = vsel %vm698_vm8, %v566_v62, %v762_v6  ;;  %858 = vst [vmem:[#allocation2 + $0x48] sm:$0xff] %v794_v11  ;;  %v799_v17 = vsel %vm671_vm9, %v459_v3, %v735_v9  ;;  %v462_v19 = vadd.f32 %v1053_v15, %v1331_v35  ;;  %v590_v20 = vadd.f32 %v1085_v16, %v1331_v35 }
  0xec   :  { %890 = vst [vmem:[#allocation2 + $0x148] sm:$0xff] %v826_v12  ;;  %v831_v18 = vsel %vm703_vm10, %v587_v4, %v767_v10  ;;  %863 = vst [vmem:[#allocation2 + $0x70] sm:$0xff] %v799_v17  ;;  %vm669_vm11 = vcmp.gt.f32.partialorder %v451_v13, 0.0  ;;  %v733_v21 = vmul.f32 0.2, %v451_v13  ;;  %vm701_vm12 = vcmp.gt.f32.partialorder %v579_v14, 0.0  ;;  %v453_v23 = vpop.f32.mrf.mxu0  ;;  %v581_v24 = vpop.f32.mrf.mxu1 }
  0xed   :  { %895 = vst [vmem:[#allocation2 + $0x170] sm:$0xff] %v831_v18  ;;  %v765_v22 = vmul.f32 0.2, %v579_v14  ;;  %vm672_vm13 = vcmp.gt.f32.partialorder %v462_v19, 0.0  ;;  %v736_v25 = vmul.f32 0.2, %v462_v19  ;;  %v454_v29 = vadd.f32 %v1331_v35, %v453_v23 }
  0xee   :  { %vm704_vm14 = vcmp.gt.f32.partialorder %v590_v20, 0.0  ;;  %v768_v26 = vmul.f32 0.2, %v590_v20  ;;  %v797_v27 = vsel %vm669_vm11, %v451_v13, %v733_v21  ;;  %v582_v30 = vadd.f32 %v1331_v35, %v581_v24  ;;  %v1056_v31 = vpop.f32.mrf.mxu0  ;;  %v1088_v32 = vpop.f32.mrf.mxu1 }
  0xef   :  { %v829_v28 = vsel %vm701_vm12, %v579_v14, %v765_v22  ;;  %861 = vst [vmem:[#allocation2 + $0x60] sm:$0xff] %v797_v27  ;;  %v800_v33 = vsel %vm672_vm13, %v462_v19, %v736_v25  ;;  %v475_v36 = vadd.f32 %v1056_v31, %v1331_v35  ;;  %v603_v37 = vadd.f32 %v1088_v32, %v1331_v35 }
  0xf0   :  { %893 = vst [vmem:[#allocation2 + $0x160] sm:$0xff] %v829_v28  ;;  %v832_v34 = vsel %vm704_vm14, %v590_v20, %v768_v26  ;;  %864 = vst [vmem:[#allocation2 + $0x78] sm:$0xff] %v800_v33  ;;  %vm670_vm15 = vcmp.gt.f32.partialorder %v454_v29, 0.0  ;;  %v734_v38 = vmul.f32 0.2, %v454_v29  ;;  %vm702_vm0 = vcmp.gt.f32.partialorder %v582_v30, 0.0  ;;  %v466_v40 = vpop.f32.mrf.mxu0  ;;  %v594_v41 = vpop.f32.mrf.mxu1 }
  0xf1   :  { %896 = vst [vmem:[#allocation2 + $0x178] sm:$0xff] %v832_v34  ;;  %v766_v39 = vmul.f32 0.2, %v582_v30  ;;  %vm675_vm1 = vcmp.gt.f32.partialorder %v475_v36, 0.0  ;;  %v739_v42 = vmul.f32 0.2, %v475_v36  ;;  %v467_v46 = vadd.f32 %v1331_v35, %v466_v40 }
  0xf2   :  { %vm707_vm2 = vcmp.gt.f32.partialorder %v603_v37, 0.0  ;;  %v771_v43 = vmul.f32 0.2, %v603_v37  ;;  %v798_v44 = vsel %vm670_vm15, %v454_v29, %v734_v38  ;;  %v595_v47 = vadd.f32 %v1331_v35, %v594_v41  ;;  %v1057_v48 = vpop.f32.mrf.mxu0  ;;  %v1089_v49 = vpop.f32.mrf.mxu1 }
  0xf3   :  { %v830_v45 = vsel %vm702_vm0, %v582_v30, %v766_v39  ;;  %862 = vst [vmem:[#allocation2 + $0x68] sm:$0xff] %v798_v44  ;;  %v803_v50 = vsel %vm675_vm1, %v475_v36, %v739_v42  ;;  %v478_v52 = vadd.f32 %v1057_v48, %v1331_v35  ;;  %v606_v53 = vadd.f32 %v1089_v49, %v1331_v35 }
  0xf4   :  { %894 = vst [vmem:[#allocation2 + $0x168] sm:$0xff] %v830_v45  ;;  %v835_v51 = vsel %vm707_vm2, %v603_v37, %v771_v43  ;;  %867 = vst [vmem:[#allocation2 + $0x90] sm:$0xff] %v803_v50  ;;  %vm673_vm3 = vcmp.gt.f32.partialorder %v467_v46, 0.0  ;;  %v737_v54 = vmul.f32 0.2, %v467_v46  ;;  %vm705_vm4 = vcmp.gt.f32.partialorder %v595_v47, 0.0  ;;  %v469_v56 = vpop.f32.mrf.mxu0  ;;  %v597_v57 = vpop.f32.mrf.mxu1 }
  0xf5   :  { %899 = vst [vmem:[#allocation2 + $0x190] sm:$0xff] %v835_v51  ;;  %v769_v55 = vmul.f32 0.2, %v595_v47  ;;  %vm676_vm5 = vcmp.gt.f32.partialorder %v478_v52, 0.0  ;;  %v740_v58 = vmul.f32 0.2, %v478_v52  ;;  %v470_v62 = vadd.f32 %v1331_v35, %v469_v56 }
  0xf6   :  { %vm708_vm6 = vcmp.gt.f32.partialorder %v606_v53, 0.0  ;;  %v772_v59 = vmul.f32 0.2, %v606_v53  ;;  %v801_v60 = vsel %vm673_vm3, %v467_v46, %v737_v54  ;;  %v598_v63 = vadd.f32 %v1331_v35, %v597_v57  ;;  %v1060_v0 = vpop.f32.mrf.mxu0  ;;  %v1092_v1 = vpop.f32.mrf.mxu1 }
  0xf7   :  { %v833_v61 = vsel %vm705_vm4, %v595_v47, %v769_v55  ;;  %865 = vst [vmem:[#allocation2 + $0x80] sm:$0xff] %v801_v60  ;;  %v804_v2 = vsel %vm676_vm5, %v478_v52, %v740_v58  ;;  %v491_v4 = vadd.f32 %v1060_v0, %v1331_v35  ;;  %v619_v5 = vadd.f32 %v1092_v1, %v1331_v35 }
  0xf8   :  { %897 = vst [vmem:[#allocation2 + $0x180] sm:$0xff] %v833_v61  ;;  %v836_v3 = vsel %vm708_vm6, %v606_v53, %v772_v59  ;;  %868 = vst [vmem:[#allocation2 + $0x98] sm:$0xff] %v804_v2  ;;  %vm674_vm7 = vcmp.gt.f32.partialorder %v470_v62, 0.0  ;;  %v738_v6 = vmul.f32 0.2, %v470_v62  ;;  %vm706_vm8 = vcmp.gt.f32.partialorder %v598_v63, 0.0  ;;  %v482_v8 = vpop.f32.mrf.mxu0  ;;  %v610_v9 = vpop.f32.mrf.mxu1 }
  0xf9   :  { %900 = vst [vmem:[#allocation2 + $0x198] sm:$0xff] %v836_v3  ;;  %v770_v7 = vmul.f32 0.2, %v598_v63  ;;  %vm679_vm9 = vcmp.gt.f32.partialorder %v491_v4, 0.0  ;;  %v743_v10 = vmul.f32 0.2, %v491_v4  ;;  %v483_v14 = vadd.f32 %v1331_v35, %v482_v8 }
  0xfa   :  { %vm711_vm10 = vcmp.gt.f32.partialorder %v619_v5, 0.0  ;;  %v775_v11 = vmul.f32 0.2, %v619_v5  ;;  %v802_v12 = vsel %vm674_vm7, %v470_v62, %v738_v6  ;;  %v611_v15 = vadd.f32 %v1331_v35, %v610_v9  ;;  %v1061_v16 = vpop.f32.mrf.mxu0  ;;  %v1093_v17 = vpop.f32.mrf.mxu1 }
  0xfb   :  { %v834_v13 = vsel %vm706_vm8, %v598_v63, %v770_v7  ;;  %866 = vst [vmem:[#allocation2 + $0x88] sm:$0xff] %v802_v12  ;;  %v807_v18 = vsel %vm679_vm9, %v491_v4, %v743_v10  ;;  %v494_v20 = vadd.f32 %v1061_v16, %v1331_v35  ;;  %v622_v21 = vadd.f32 %v1093_v17, %v1331_v35 }
  0xfc   :  { %898 = vst [vmem:[#allocation2 + $0x188] sm:$0xff] %v834_v13  ;;  %v839_v19 = vsel %vm711_vm10, %v619_v5, %v775_v11  ;;  %871 = vst [vmem:[#allocation2 + $0xb0] sm:$0xff] %v807_v18  ;;  %vm677_vm11 = vcmp.gt.f32.partialorder %v483_v14, 0.0  ;;  %v741_v22 = vmul.f32 0.2, %v483_v14  ;;  %vm709_vm12 = vcmp.gt.f32.partialorder %v611_v15, 0.0  ;;  %v485_v24 = vpop.f32.mrf.mxu0  ;;  %v613_v25 = vpop.f32.mrf.mxu1 }
  0xfd   :  { %903 = vst [vmem:[#allocation2 + $0x1b0] sm:$0xff] %v839_v19  ;;  %v773_v23 = vmul.f32 0.2, %v611_v15  ;;  %vm680_vm13 = vcmp.gt.f32.partialorder %v494_v20, 0.0  ;;  %v744_v26 = vmul.f32 0.2, %v494_v20  ;;  %v486_v30 = vadd.f32 %v1331_v35, %v485_v24 }
  0xfe   :  { %vm712_vm14 = vcmp.gt.f32.partialorder %v622_v21, 0.0  ;;  %v776_v27 = vmul.f32 0.2, %v622_v21  ;;  %v805_v28 = vsel %vm677_vm11, %v483_v14, %v741_v22  ;;  %v614_v31 = vadd.f32 %v1331_v35, %v613_v25  ;;  %v1064_v32 = vpop.f32.mrf.mxu0  ;;  %v1096_v33 = vpop.f32.mrf.mxu1 }
  0xff   :  { %v837_v29 = vsel %vm709_vm12, %v611_v15, %v773_v23  ;;  %869 = vst [vmem:[#allocation2 + $0xa0] sm:$0xff] %v805_v28  ;;  %v808_v34 = vsel %vm680_vm13, %v494_v20, %v744_v26  ;;  %v507_v37 = vadd.f32 %v1064_v32, %v1331_v35  ;;  %v635_v38 = vadd.f32 %v1096_v33, %v1331_v35 }
 0x100   :  { %901 = vst [vmem:[#allocation2 + $0x1a0] sm:$0xff] %v837_v29  ;;  %v840_v36 = vsel %vm712_vm14, %v622_v21, %v776_v27  ;;  %872 = vst [vmem:[#allocation2 + $0xb8] sm:$0xff] %v808_v34  ;;  %vm678_vm15 = vcmp.gt.f32.partialorder %v486_v30, 0.0  ;;  %v742_v39 = vmul.f32 0.2, %v486_v30  ;;  %vm710_vm0 = vcmp.gt.f32.partialorder %v614_v31, 0.0  ;;  %v498_v41 = vpop.f32.mrf.mxu0  ;;  %v626_v42 = vpop.f32.mrf.mxu1 }
 0x101   :  { %904 = vst [vmem:[#allocation2 + $0x1b8] sm:$0xff] %v840_v36  ;;  %v774_v40 = vmul.f32 0.2, %v614_v31  ;;  %vm683_vm1 = vcmp.gt.f32.partialorder %v507_v37, 0.0  ;;  %v747_v43 = vmul.f32 0.2, %v507_v37  ;;  %v499_v47 = vadd.f32 %v1331_v35, %v498_v41 }
 0x102   :  { %vm715_vm2 = vcmp.gt.f32.partialorder %v635_v38, 0.0  ;;  %v779_v44 = vmul.f32 0.2, %v635_v38  ;;  %v806_v45 = vsel %vm678_vm15, %v486_v30, %v742_v39  ;;  %v627_v48 = vadd.f32 %v1331_v35, %v626_v42  ;;  %v1065_v49 = vpop.f32.mrf.mxu0  ;;  %v1097_v50 = vpop.f32.mrf.mxu1 }
 0x103   :  { %v838_v46 = vsel %vm710_vm0, %v614_v31, %v774_v40  ;;  %870 = vst [vmem:[#allocation2 + $0xa8] sm:$0xff] %v806_v45  ;;  %v811_v51 = vsel %vm683_vm1, %v507_v37, %v747_v43  ;;  %v510_v53 = vadd.f32 %v1065_v49, %v1331_v35  ;;  %v638_v54 = vadd.f32 %v1097_v50, %v1331_v35 }
 0x104   :  { %902 = vst [vmem:[#allocation2 + $0x1a8] sm:$0xff] %v838_v46  ;;  %v843_v52 = vsel %vm715_vm2, %v635_v38, %v779_v44  ;;  %875 = vst [vmem:[#allocation2 + $0xd0] sm:$0xff] %v811_v51  ;;  %vm681_vm3 = vcmp.gt.f32.partialorder %v499_v47, 0.0  ;;  %v745_v55 = vmul.f32 0.2, %v499_v47  ;;  %vm713_vm4 = vcmp.gt.f32.partialorder %v627_v48, 0.0  ;;  %v501_v57 = vpop.f32.mrf.mxu0  ;;  %v629_v58 = vpop.f32.mrf.mxu1 }
 0x105   :  { %907 = vst [vmem:[#allocation2 + $0x1d0] sm:$0xff] %v843_v52  ;;  %v777_v56 = vmul.f32 0.2, %v627_v48  ;;  %vm684_vm5 = vcmp.gt.f32.partialorder %v510_v53, 0.0  ;;  %v748_v59 = vmul.f32 0.2, %v510_v53  ;;  %v502_v63 = vadd.f32 %v1331_v35, %v501_v57 }
 0x106   :  { %vm716_vm6 = vcmp.gt.f32.partialorder %v638_v54, 0.0  ;;  %v780_v60 = vmul.f32 0.2, %v638_v54  ;;  %v809_v61 = vsel %vm681_vm3, %v499_v47, %v745_v55  ;;  %v630_v0 = vadd.f32 %v1331_v35, %v629_v58  ;;  %v1068_v1 = vpop.f32.mrf.mxu0  ;;  %v1100_v2 = vpop.f32.mrf.mxu1 }
 0x107   :  { %v841_v62 = vsel %vm713_vm4, %v627_v48, %v777_v56  ;;  %873 = vst [vmem:[#allocation2 + $0xc0] sm:$0xff] %v809_v61  ;;  %v812_v3 = vsel %vm684_vm5, %v510_v53, %v748_v59  ;;  %v523_v5 = vadd.f32 %v1068_v1, %v1331_v35  ;;  %v651_v6 = vadd.f32 %v1100_v2, %v1331_v35 }
 0x108   :  { %905 = vst [vmem:[#allocation2 + $0x1c0] sm:$0xff] %v841_v62  ;;  %v844_v4 = vsel %vm716_vm6, %v638_v54, %v780_v60  ;;  %876 = vst [vmem:[#allocation2 + $0xd8] sm:$0xff] %v812_v3  ;;  %vm682_vm7 = vcmp.gt.f32.partialorder %v502_v63, 0.0  ;;  %v746_v7 = vmul.f32 0.2, %v502_v63  ;;  %vm714_vm8 = vcmp.gt.f32.partialorder %v630_v0, 0.0  ;;  %v514_v9 = vpop.f32.mrf.mxu0  ;;  %v642_v10 = vpop.f32.mrf.mxu1 }
 0x109   :  { %908 = vst [vmem:[#allocation2 + $0x1d8] sm:$0xff] %v844_v4  ;;  %v778_v8 = vmul.f32 0.2, %v630_v0  ;;  %vm687_vm9 = vcmp.gt.f32.partialorder %v523_v5, 0.0  ;;  %v751_v11 = vmul.f32 0.2, %v523_v5  ;;  %v515_v15 = vadd.f32 %v1331_v35, %v514_v9 }
 0x10a   :  { %vm719_vm10 = vcmp.gt.f32.partialorder %v651_v6, 0.0  ;;  %v783_v12 = vmul.f32 0.2, %v651_v6  ;;  %v810_v13 = vsel %vm682_vm7, %v502_v63, %v746_v7  ;;  %v643_v16 = vadd.f32 %v1331_v35, %v642_v10  ;;  %v1069_v17 = vpop.f32.mrf.mxu0  ;;  %v1101_v18 = vpop.f32.mrf.mxu1 }
 0x10b   :  { %v842_v14 = vsel %vm714_vm8, %v630_v0, %v778_v8  ;;  %874 = vst [vmem:[#allocation2 + $0xc8] sm:$0xff] %v810_v13  ;;  %v815_v19 = vsel %vm687_vm9, %v523_v5, %v751_v11  ;;  %v526_v21 = vadd.f32 %v1069_v17, %v1331_v35  ;;  %v654_v22 = vadd.f32 %v1101_v18, %v1331_v35 }
 0x10c   :  { %906 = vst [vmem:[#allocation2 + $0x1c8] sm:$0xff] %v842_v14  ;;  %v847_v20 = vsel %vm719_vm10, %v651_v6, %v783_v12  ;;  %879 = vst [vmem:[#allocation2 + $0xf0] sm:$0xff] %v815_v19  ;;  %vm685_vm11 = vcmp.gt.f32.partialorder %v515_v15, 0.0  ;;  %v749_v23 = vmul.f32 0.2, %v515_v15  ;;  %vm717_vm12 = vcmp.gt.f32.partialorder %v643_v16, 0.0  ;;  %v517_v25 = vpop.f32.mrf.mxu0  ;;  %v645_v26 = vpop.f32.mrf.mxu1 }
 0x10d   :  { %911 = vst [vmem:[#allocation2 + $0x1f0] sm:$0xff] %v847_v20  ;;  %v781_v24 = vmul.f32 0.2, %v643_v16  ;;  %vm688_vm13 = vcmp.gt.f32.partialorder %v526_v21, 0.0  ;;  %v752_v27 = vmul.f32 0.2, %v526_v21  ;;  %v518_v31 = vadd.f32 %v1331_v35, %v517_v25 }
 0x10e   :  { %vm720_vm14 = vcmp.gt.f32.partialorder %v654_v22, 0.0  ;;  %v784_v28 = vmul.f32 0.2, %v654_v22  ;;  %v813_v29 = vsel %vm685_vm11, %v515_v15, %v749_v23  ;;  %v646_v32 = vadd.f32 %v1331_v35, %v645_v26 }
 0x10f   :  { %v845_v30 = vsel %vm717_vm12, %v643_v16, %v781_v24  ;;  %877 = vst [vmem:[#allocation2 + $0xe0] sm:$0xff] %v813_v29  ;;  %v816_v33 = vsel %vm688_vm13, %v526_v21, %v752_v27  ;;  %vm686_vm15 = vcmp.gt.f32.partialorder %v518_v31, 0.0  ;;  %v750_v36 = vmul.f32 0.2, %v518_v31 }
 0x110   :  { %909 = vst [vmem:[#allocation2 + $0x1e0] sm:$0xff] %v845_v30  ;;  %v848_v34 = vsel %vm720_vm14, %v654_v22, %v784_v28  ;;  %880 = vst [vmem:[#allocation2 + $0xf8] sm:$0xff] %v816_v33  ;;  %vm718_vm0 = vcmp.gt.f32.partialorder %v646_v32, 0.0  ;;  %v782_v37 = vmul.f32 0.2, %v646_v32 }
 0x111   :  { %912 = vst [vmem:[#allocation2 + $0x1f8] sm:$0xff] %v848_v34  ;;  %v814_v38 = vsel %vm686_vm15, %v518_v31, %v750_v36 }
 0x112   :  { %v846_v39 = vsel %vm718_vm0, %v646_v32, %v782_v37  ;;  %878 = vst [vmem:[#allocation2 + $0xe8] sm:$0xff] %v814_v38 }
 0x113   :  { %910 = vst [vmem:[#allocation2 + $0x1e8] sm:$0xff] %v846_v39 }
 0x114   :  { %1157 = shalt.err (!%p1154_p4)
}
 0x115   :  { %s1169_s28 = smov 128   ;;  %s1170_s29 = smov 8  }
 0x116   :  { %924 = dma.vmem_to_hbm [thread:$0]  %s919_s2, 8192, %s1403_s3, [#allocation3], %s1169_s28, %s1169_s28, %s1170_s29  }
 0x117   :  { %1166 = dma.done.wait [#allocation3], 8192  }
 0x118   :  { %1167 = vsyncadd [#allocation3], 4294959104 }
 0x119   :  { %928 = vsyncpa [#allocation3], 1 }

</bundles_post_ra>
